<compile_context>
chip_gen: v6e
topology: v6e:2x2x1
jax: 0.10.0
libtpu: 0.0.40
codegen_flags: <defaults>
</compile_context>

<pallas_src>
import functools

import numpy as np
import jax
import jax.numpy as jnp
from jax.experimental import pallas as pl
from jax.experimental.pallas import tpu as pltpu


def _banded_conv_weights(w_hwio, out_w):
    """Fold the kw taps of a 3x3 'same' conv into banded matmul RHS matrices.

    w_hwio : (3, 3, Cin, Cout) weights (kh, kw, cin, cout).
    returns: (3, out_w*Cin, out_w*Cout) float32; band kh maps an input-row slab
             [wc*Cin + cin] to an output-row slab [wo*Cout + c] with
             band[kh][wc*Cin+cin, wo*Cout+c] = w[kh, wc-wo+1, cin, c]
             whenever that tap is in range (W zero-padding handled by omission).
    """
    w = np.asarray(w_hwio, np.float32)
    kh_n, kw_n, cin, cout = w.shape
    bands = np.zeros((kh_n, out_w * cin, out_w * cout), np.float32)
    for kh in range(kh_n):
        for kw in range(kw_n):
            for wc in range(out_w):          # input column (unpadded index)
                wo = wc - kw + 1             # output column that uses tap (kh, kw)
                if 0 <= wo < out_w:
                    bands[kh,
                          wc * cin:(wc + 1) * cin,
                          wo * cout:(wo + 1) * cout] = w[kh, kw]
    return bands


def _fused_features_kernel(x_ref, w0_ref, b0_ref, w1_ref, b1_ref, o_ref,
                           xpad_ref, acc0_ref, hm_ref, ppad_ref,
                           *, H, W, C1, C2):
    """One batch element: conv'0' -> ReLU'1' -> maxpool'2' -> conv'3' -> ReLU'4'.

    x_ref  : (1, H, W*Cin)      f32   input rows, channels-last on the lanes
    w0_ref : (3, W*Cin, W*C1)   bf16  banded conv-0 weights (one band per kh)
    b0_ref : (1, C1)            f32
    w1_ref : (3, Wo*C1, Wo*C2)  bf16  banded conv-3 weights
    b1_ref : (1, Wo*C2)         f32   conv-3 bias tiled over Wo
    o_ref  : (1, Ho, Wo*C2)     f32   lane-dense output slab
    """
    Ho, Wo = H // 2, W // 2

    # --- layer '0' (conv 3x3, pad 1): zero-pad rows (H direction) in VMEM ---
    xpad_ref[...] = jnp.zeros_like(xpad_ref)
    xpad_ref[1:H + 1, :] = x_ref[0]

    # Three row-shifted banded matmuls (one per kh tap); kw taps live in the RHS.
    acc0_ref[...] = (
        jnp.dot(xpad_ref[0:H, :].astype(jnp.bfloat16), w0_ref[0],
                preferred_element_type=jnp.float32)
        + jnp.dot(xpad_ref[1:H + 1, :].astype(jnp.bfloat16), w0_ref[1],
                  preferred_element_type=jnp.float32)
        + jnp.dot(xpad_ref[2:H + 2, :].astype(jnp.bfloat16), w0_ref[2],
                  preferred_element_type=jnp.float32))

    # --- layers '1' + '2' (ReLU + maxpool 2x2), fused epilogue ---------------
    # Exact reorder: pool the pre-activation, then add the per-channel bias and
    # ReLU (max commutes with monotonic per-channel transforms).
    for r in range(Ho):                       # pool along H (sublane row pairs)
        hm_ref[r:r + 1, :] = jnp.maximum(acc0_ref[2 * r:2 * r + 1, :],
                                         acc0_ref[2 * r + 1:2 * r + 2, :])
    ppad_ref[...] = jnp.zeros_like(ppad_ref)  # also provides conv-3 H padding
    b0 = b0_ref[...]
    for wo in range(Wo):                      # pool along W (lane-group pairs)
        lo = 2 * wo * C1
        m = jnp.maximum(hm_ref[:, lo:lo + C1], hm_ref[:, lo + C1:lo + 2 * C1])
        ppad_ref[1:Ho + 1, wo * C1:(wo + 1) * C1] = jnp.maximum(m + b0, 0.0)

    # --- layer '3' (conv 3x3, pad 1) + layer '4' (ReLU) ----------------------
    acc1 = (
        jnp.dot(ppad_ref[0:Ho, :].astype(jnp.bfloat16), w1_ref[0],
                preferred_element_type=jnp.float32)
        + jnp.dot(ppad_ref[1:Ho + 1, :].astype(jnp.bfloat16), w1_ref[1],
                  preferred_element_type=jnp.float32)
        + jnp.dot(ppad_ref[2:Ho + 2, :].astype(jnp.bfloat16), w1_ref[2],
                  preferred_element_type=jnp.float32))
    o_ref[0] = jnp.maximum(acc1 + b1_ref[...], 0.0).astype(o_ref.dtype)


class PartialModelPallas:
    """JAX/Pallas port of PartialModel(original_model, stop_layer_name)."""

    _LAYERS = ["0", "1", "2", "3", "4", "5"]   # conv, relu, pool, conv, relu, pool

    def __init__(self, stop_layer_name="5"):
        # Deterministic synthetic parameters for the assumed original model.
        key = jax.random.PRNGKey(42)
        k0, k1, k2, k3 = jax.random.split(key, 4)
        self.w0 = jax.random.normal(k0, (3, 3, 4, 8), jnp.float32) / float(np.sqrt(3 * 3 * 4))
        self.b0 = jax.random.normal(k1, (8,), jnp.float32) * 0.01
        self.w1 = jax.random.normal(k2, (3, 3, 8, 16), jnp.float32) / float(np.sqrt(3 * 3 * 8))
        self.b1 = jax.random.normal(k3, (16,), jnp.float32) * 0.01

        # Mirror PartialModel.__init__: keep layers until stop_layer_name.
        self.features = []
        for name in self._LAYERS:
            if name == stop_layer_name:
                break
            self.features.append(name)
        if self.features != ["0", "1", "2", "3", "4"]:
            # TODO(synk): generic fused dispatch for other stop layers; only the
            # conv-relu-pool-conv-relu prefix (stop at '5') is implemented.
            raise NotImplementedError("fused kernel implements stop_layer_name='5'")

        # Kernel-side parameter layouts (built once, on the host).
        self._w0_bands = jnp.asarray(_banded_conv_weights(self.w0, 16), jnp.bfloat16)
        self._w1_bands = jnp.asarray(_banded_conv_weights(self.w1, 8), jnp.bfloat16)
        self._b0_row = jnp.asarray(np.asarray(self.b0).reshape(1, 8), jnp.float32)
        self._b1_row = jnp.asarray(np.tile(np.asarray(self.b1), 8).reshape(1, 128),
                                   jnp.float32)

        self._forward = jax.jit(self._forward_impl)

    # ------------------------------------------------------------------ fused
    def _forward_impl(self, x_nchw):
        N, Cin, H, W = x_nchw.shape
        if Cin != 4 or W != 16 or H % 2 != 0:
            raise ValueError(f"unsupported input shape {x_nchw.shape}")
        C1, C2 = 8, 16
        Ho, Wo = H // 2, W // 2

        # Layout glue: NCHW -> channels-last rows (N, H, W*Cin).
        x_rows = jnp.transpose(x_nchw, (0, 2, 3, 1)).reshape(N, H, W * Cin)
        x_rows = x_rows.astype(jnp.float32)

        kern = functools.partial(_fused_features_kernel, H=H, W=W, C1=C1, C2=C2)
        out = pl.pallas_call(
            kern,
            out_shape=jax.ShapeDtypeStruct((N, Ho, Wo * C2), jnp.float32),
            grid=(N,),
            in_specs=[
                pl.BlockSpec((1, H, W * Cin), lambda n: (n, 0, 0)),
                pl.BlockSpec((3, W * Cin, W * C1), lambda n: (0, 0, 0)),
                pl.BlockSpec((1, C1), lambda n: (0, 0)),
                pl.BlockSpec((3, Wo * C1, Wo * C2), lambda n: (0, 0, 0)),
                pl.BlockSpec((1, Wo * C2), lambda n: (0, 0)),
            ],
            out_specs=pl.BlockSpec((1, Ho, Wo * C2), lambda n: (n, 0, 0)),
            scratch_shapes=[
                pltpu.VMEM((H + 2, W * Cin), jnp.float32),    # H-padded input rows
                pltpu.VMEM((H, W * C1), jnp.float32),         # conv-0 pre-activation
                pltpu.VMEM((Ho, W * C1), jnp.float32),        # H-pooled rows
                pltpu.VMEM((Ho + 2, Wo * C1), jnp.float32),   # pooled + pad (conv-3 in)
            ],
            compiler_params=pltpu.CompilerParams(
                dimension_semantics=("parallel",)),
        )(x_rows, self._w0_bands, self._b0_row, self._w1_bands, self._b1_row)

        # Layout glue back: (N, Ho, Wo*C2) -> NHWC -> NCHW.
        out = out.reshape(N, Ho, Wo, C2)
        return jnp.transpose(out, (0, 3, 1, 2))

    def __call__(self, x_nchw):
        return self._forward(x_nchw)

    # ---------------------------------------------------------------- reference
    def reference(self, x_nchw):
        """Pure-XLA reference of the same kept prefix (same bf16 MXU inputs)."""
        dn = ("NHWC", "HWIO", "NHWC")
        x = jnp.transpose(x_nchw, (0, 2, 3, 1)).astype(jnp.bfloat16)
        y = jax.lax.conv_general_dilated(
            x, self.w0.astype(jnp.bfloat16), (1, 1), "SAME",
            dimension_numbers=dn, preferred_element_type=jnp.float32)
        y = jnp.maximum(y + self.b0, 0.0)
        y = jax.lax.reduce_window(y, -jnp.inf, jax.lax.max,
                                  (1, 2, 2, 1), (1, 2, 2, 1), "VALID")
        y = jax.lax.conv_general_dilated(
            y.astype(jnp.bfloat16), self.w1.astype(jnp.bfloat16), (1, 1), "SAME",
            dimension_numbers=dn, preferred_element_type=jnp.float32)
        y = jnp.maximum(y + self.b1, 0.0)
        return jnp.transpose(y, (0, 3, 1, 2))


if __name__ == "__main__":
    x = jax.random.normal(jax.random.PRNGKey(0), (2, 4, 16, 16), jnp.float32)
    model = PartialModelPallas(stop_layer_name="5")

    y = jax.block_until_ready(model(x))

    # layers '0'..'4': conv(4->8) -> relu -> maxpool2 -> conv(8->16) -> relu
    assert y.shape == (2, 16, 8, 8), y.shape
    assert bool(jnp.all(y >= 0.0))            # last kept layer is a ReLU

    y_ref = jax.block_until_ready(model.reference(x))
    max_diff = float(jnp.max(jnp.abs(y - y_ref)))
    assert jnp.allclose(y, y_ref, rtol=5e-2, atol=5e-2), max_diff

    print("KERNEL_OK")
</pallas_src>

<mosaic_0001>
module attributes {stable_mosaic.version = 11 : i64} {
  func.func @_fused_features_kernel(%arg0: i32, %arg1: memref<1x16x64xf32, #tpu.memory_space<vmem>>, %arg2: memref<3x64x128xbf16, #tpu.memory_space<vmem>>, %arg3: memref<1x8xf32, #tpu.memory_space<vmem>>, %arg4: memref<3x64x128xbf16, #tpu.memory_space<vmem>>, %arg5: memref<1x128xf32, #tpu.memory_space<vmem>>, %arg6: memref<1x8x128xf32, #tpu.memory_space<vmem>>, %arg7: memref<18x64xf32, #tpu.memory_space<vmem>>, %arg8: memref<16x128xf32, #tpu.memory_space<vmem>>, %arg9: memref<8x128xf32, #tpu.memory_space<vmem>>, %arg10: memref<10x64xf32, #tpu.memory_space<vmem>>) attributes {dimension_semantics = [#tpu.dimension_semantics<parallel>], iteration_bounds = array<i64: 2>, scalar_prefetch = 0 : i64, scratch_operands = 4 : i64, tpu.core_type = #tpu.core_type<tc>, window_params = [{transform_indices = @transform_0, window_bounds = array<i64: 1, 16, 64>}, {pipeline_mode = #tpu.pipeline_mode<synchronous>, transform_indices = @transform_1, window_bounds = array<i64: 3, 64, 128>}, {pipeline_mode = #tpu.pipeline_mode<synchronous>, transform_indices = @transform_2, window_bounds = array<i64: 1, 8>}, {pipeline_mode = #tpu.pipeline_mode<synchronous>, transform_indices = @transform_3, window_bounds = array<i64: 3, 64, 128>}, {pipeline_mode = #tpu.pipeline_mode<synchronous>, transform_indices = @transform_4, window_bounds = array<i64: 1, 128>}, {transform_indices = @transform_5, window_bounds = array<i64: 1, 8, 128>}]} {
    %cst = arith.constant 0.000000e+00 : f32
    %0 = vector.broadcast %cst : f32 to vector<18x64xf32>
    %c0 = arith.constant 0 : index
    %c0_0 = arith.constant 0 : index
    %1 = vector.load %arg7[%c0, %c0_0] : memref<18x64xf32, #tpu.memory_space<vmem>>, vector<18x64xf32>
    tpu.vector_store %arg7[%c0, %c0_0], %0 {strides = array<i32>} : memref<18x64xf32, #tpu.memory_space<vmem>>, vector<18x64xf32>,
    %c0_1 = arith.constant 0 : index
    %c0_2 = arith.constant 0 : index
    %c0_3 = arith.constant 0 : index
    %2 = vector.load %arg1[%c0_1, %c0_2, %c0_3] : memref<1x16x64xf32, #tpu.memory_space<vmem>>, vector<1x16x64xf32>
    %3 = vector.shape_cast %2 : vector<1x16x64xf32> to vector<16x64xf32>
    %c1 = arith.constant 1 : index
    %c0_4 = arith.constant 0 : index
    %4 = vector.load %arg7[%c1, %c0_4] : memref<18x64xf32, #tpu.memory_space<vmem>>, vector<16x64xf32>
    tpu.vector_store %arg7[%c1, %c0_4], %3 {strides = array<i32>} : memref<18x64xf32, #tpu.memory_space<vmem>>, vector<16x64xf32>,
    %c0_5 = arith.constant 0 : index
    %c0_6 = arith.constant 0 : index
    %5 = vector.load %arg7[%c0_5, %c0_6] : memref<18x64xf32, #tpu.memory_space<vmem>>, vector<16x64xf32>
    %6 = arith.truncf %5 : vector<16x64xf32> to vector<16x64xbf16>
    %c0_7 = arith.constant 0 : index
    %c0_8 = arith.constant 0 : index
    %c0_9 = arith.constant 0 : index
    %7 = vector.load %arg2[%c0_7, %c0_8, %c0_9] : memref<3x64x128xbf16, #tpu.memory_space<vmem>>, vector<1x64x128xbf16>
    %8 = vector.shape_cast %7 : vector<1x64x128xbf16> to vector<64x128xbf16>
    %cst_10 = arith.constant dense<0.000000e+00> : vector<16x128xf32>
    %9 = tpu.matmul %6, %8, %cst_10 {dimension_numbers = #tpu.dot_dimension_numbers<[1], [0], [0], [1], [0, 0, 1, 1], [], []>} : vector<16x64xbf16>, vector<64x128xbf16>, vector<16x128xf32> -> vector<16x128xf32>
    %c1_11 = arith.constant 1 : index
    %c0_12 = arith.constant 0 : index
    %10 = vector.load %arg7[%c1_11, %c0_12] : memref<18x64xf32, #tpu.memory_space<vmem>>, vector<16x64xf32>
    %11 = arith.truncf %10 : vector<16x64xf32> to vector<16x64xbf16>
    %c1_13 = arith.constant 1 : index
    %c0_14 = arith.constant 0 : index
    %c0_15 = arith.constant 0 : index
    %12 = vector.load %arg2[%c1_13, %c0_14, %c0_15] : memref<3x64x128xbf16, #tpu.memory_space<vmem>>, vector<1x64x128xbf16>
    %13 = vector.shape_cast %12 : vector<1x64x128xbf16> to vector<64x128xbf16>
    %cst_16 = arith.constant dense<0.000000e+00> : vector<16x128xf32>
    %14 = tpu.matmul %11, %13, %cst_16 {dimension_numbers = #tpu.dot_dimension_numbers<[1], [0], [0], [1], [0, 0, 1, 1], [], []>} : vector<16x64xbf16>, vector<64x128xbf16>, vector<16x128xf32> -> vector<16x128xf32>
    %15 = arith.addf %9, %14 : vector<16x128xf32>
    %c2 = arith.constant 2 : index
    %c0_17 = arith.constant 0 : index
    %16 = vector.load %arg7[%c2, %c0_17] : memref<18x64xf32, #tpu.memory_space<vmem>>, vector<16x64xf32>
    %17 = arith.truncf %16 : vector<16x64xf32> to vector<16x64xbf16>
    %c2_18 = arith.constant 2 : index
    %c0_19 = arith.constant 0 : index
    %c0_20 = arith.constant 0 : index
    %18 = vector.load %arg2[%c2_18, %c0_19, %c0_20] : memref<3x64x128xbf16, #tpu.memory_space<vmem>>, vector<1x64x128xbf16>
    %19 = vector.shape_cast %18 : vector<1x64x128xbf16> to vector<64x128xbf16>
    %cst_21 = arith.constant dense<0.000000e+00> : vector<16x128xf32>
    %20 = tpu.matmul %17, %19, %cst_21 {dimension_numbers = #tpu.dot_dimension_numbers<[1], [0], [0], [1], [0, 0, 1, 1], [], []>} : vector<16x64xbf16>, vector<64x128xbf16>, vector<16x128xf32> -> vector<16x128xf32>
    %21 = arith.addf %15, %20 : vector<16x128xf32>
    %c0_22 = arith.constant 0 : index
    %c0_23 = arith.constant 0 : index
    %22 = vector.load %arg8[%c0_22, %c0_23] : memref<16x128xf32, #tpu.memory_space<vmem>>, vector<16x128xf32>
    tpu.vector_store %arg8[%c0_22, %c0_23], %21 {strides = array<i32>} : memref<16x128xf32, #tpu.memory_space<vmem>>, vector<16x128xf32>,
    %c0_24 = arith.constant 0 : index
    %c0_25 = arith.constant 0 : index
    %23 = vector.load %arg8[%c0_24, %c0_25] : memref<16x128xf32, #tpu.memory_space<vmem>>, vector<1x128xf32>
    %c1_26 = arith.constant 1 : index
    %c0_27 = arith.constant 0 : index
    %24 = vector.load %arg8[%c1_26, %c0_27] : memref<16x128xf32, #tpu.memory_space<vmem>>, vector<1x128xf32>
    %25 = arith.maximumf %23, %24 : vector<1x128xf32>
    %c0_28 = arith.constant 0 : index
    %c0_29 = arith.constant 0 : index
    %26 = vector.load %arg9[%c0_28, %c0_29] : memref<8x128xf32, #tpu.memory_space<vmem>>, vector<1x128xf32>
    tpu.vector_store %arg9[%c0_28, %c0_29], %25 {strides = array<i32>} : memref<8x128xf32, #tpu.memory_space<vmem>>, vector<1x128xf32>,
    %c2_30 = arith.constant 2 : index
    %c0_31 = arith.constant 0 : index
    %27 = vector.load %arg8[%c2_30, %c0_31] : memref<16x128xf32, #tpu.memory_space<vmem>>, vector<1x128xf32>
    %c3 = arith.constant 3 : index
    %c0_32 = arith.constant 0 : index
    %28 = vector.load %arg8[%c3, %c0_32] : memref<16x128xf32, #tpu.memory_space<vmem>>, vector<1x128xf32>
    %29 = arith.maximumf %27, %28 : vector<1x128xf32>
    %c1_33 = arith.constant 1 : index
    %c0_34 = arith.constant 0 : index
    %30 = vector.load %arg9[%c1_33, %c0_34] : memref<8x128xf32, #tpu.memory_space<vmem>>, vector<1x128xf32>
    tpu.vector_store %arg9[%c1_33, %c0_34], %29 {strides = array<i32>} : memref<8x128xf32, #tpu.memory_space<vmem>>, vector<1x128xf32>,
    %c4 = arith.constant 4 : index
    %c0_35 = arith.constant 0 : index
    %31 = vector.load %arg8[%c4, %c0_35] : memref<16x128xf32, #tpu.memory_space<vmem>>, vector<1x128xf32>
    %c5 = arith.constant 5 : index
    %c0_36 = arith.constant 0 : index
    %32 = vector.load %arg8[%c5, %c0_36] : memref<16x128xf32, #tpu.memory_space<vmem>>, vector<1x128xf32>
    %33 = arith.maximumf %31, %32 : vector<1x128xf32>
    %c2_37 = arith.constant 2 : index
    %c0_38 = arith.constant 0 : index
    %34 = vector.load %arg9[%c2_37, %c0_38] : memref<8x128xf32, #tpu.memory_space<vmem>>, vector<1x128xf32>
    tpu.vector_store %arg9[%c2_37, %c0_38], %33 {strides = array<i32>} : memref<8x128xf32, #tpu.memory_space<vmem>>, vector<1x128xf32>,
    %c6 = arith.constant 6 : index
    %c0_39 = arith.constant 0 : index
    %35 = vector.load %arg8[%c6, %c0_39] : memref<16x128xf32, #tpu.memory_space<vmem>>, vector<1x128xf32>
    %c7 = arith.constant 7 : index
    %c0_40 = arith.constant 0 : index
    %36 = vector.load %arg8[%c7, %c0_40] : memref<16x128xf32, #tpu.memory_space<vmem>>, vector<1x128xf32>
    %37 = arith.maximumf %35, %36 : vector<1x128xf32>
    %c3_41 = arith.constant 3 : index
    %c0_42 = arith.constant 0 : index
    %38 = vector.load %arg9[%c3_41, %c0_42] : memref<8x128xf32, #tpu.memory_space<vmem>>, vector<1x128xf32>
    tpu.vector_store %arg9[%c3_41, %c0_42], %37 {strides = array<i32>} : memref<8x128xf32, #tpu.memory_space<vmem>>, vector<1x128xf32>,
    %c8 = arith.constant 8 : index
    %c0_43 = arith.constant 0 : index
    %39 = vector.load %arg8[%c8, %c0_43] : memref<16x128xf32, #tpu.memory_space<vmem>>, vector<1x128xf32>
    %c9 = arith.constant 9 : index
    %c0_44 = arith.constant 0 : index
    %40 = vector.load %arg8[%c9, %c0_44] : memref<16x128xf32, #tpu.memory_space<vmem>>, vector<1x128xf32>
    %41 = arith.maximumf %39, %40 : vector<1x128xf32>
    %c4_45 = arith.constant 4 : index
    %c0_46 = arith.constant 0 : index
    %42 = vector.load %arg9[%c4_45, %c0_46] : memref<8x128xf32, #tpu.memory_space<vmem>>, vector<1x128xf32>
    tpu.vector_store %arg9[%c4_45, %c0_46], %41 {strides = array<i32>} : memref<8x128xf32, #tpu.memory_space<vmem>>, vector<1x128xf32>,
    %c10 = arith.constant 10 : index
    %c0_47 = arith.constant 0 : index
    %43 = vector.load %arg8[%c10, %c0_47] : memref<16x128xf32, #tpu.memory_space<vmem>>, vector<1x128xf32>
    %c11 = arith.constant 11 : index
    %c0_48 = arith.constant 0 : index
    %44 = vector.load %arg8[%c11, %c0_48] : memref<16x128xf32, #tpu.memory_space<vmem>>, vector<1x128xf32>
    %45 = arith.maximumf %43, %44 : vector<1x128xf32>
    %c5_49 = arith.constant 5 : index
    %c0_50 = arith.constant 0 : index
    %46 = vector.load %arg9[%c5_49, %c0_50] : memref<8x128xf32, #tpu.memory_space<vmem>>, vector<1x128xf32>
    tpu.vector_store %arg9[%c5_49, %c0_50], %45 {strides = array<i32>} : memref<8x128xf32, #tpu.memory_space<vmem>>, vector<1x128xf32>,
    %c12 = arith.constant 12 : index
    %c0_51 = arith.constant 0 : index
    %47 = vector.load %arg8[%c12, %c0_51] : memref<16x128xf32, #tpu.memory_space<vmem>>, vector<1x128xf32>
    %c13 = arith.constant 13 : index
    %c0_52 = arith.constant 0 : index
    %48 = vector.load %arg8[%c13, %c0_52] : memref<16x128xf32, #tpu.memory_space<vmem>>, vector<1x128xf32>
    %49 = arith.maximumf %47, %48 : vector<1x128xf32>
    %c6_53 = arith.constant 6 : index
    %c0_54 = arith.constant 0 : index
    %50 = vector.load %arg9[%c6_53, %c0_54] : memref<8x128xf32, #tpu.memory_space<vmem>>, vector<1x128xf32>
    tpu.vector_store %arg9[%c6_53, %c0_54], %49 {strides = array<i32>} : memref<8x128xf32, #tpu.memory_space<vmem>>, vector<1x128xf32>,
    %c14 = arith.constant 14 : index
    %c0_55 = arith.constant 0 : index
    %51 = vector.load %arg8[%c14, %c0_55] : memref<16x128xf32, #tpu.memory_space<vmem>>, vector<1x128xf32>
    %c15 = arith.constant 15 : index
    %c0_56 = arith.constant 0 : index
    %52 = vector.load %arg8[%c15, %c0_56] : memref<16x128xf32, #tpu.memory_space<vmem>>, vector<1x128xf32>
    %53 = arith.maximumf %51, %52 : vector<1x128xf32>
    %c7_57 = arith.constant 7 : index
    %c0_58 = arith.constant 0 : index
    %54 = vector.load %arg9[%c7_57, %c0_58] : memref<8x128xf32, #tpu.memory_space<vmem>>, vector<1x128xf32>
    tpu.vector_store %arg9[%c7_57, %c0_58], %53 {strides = array<i32>} : memref<8x128xf32, #tpu.memory_space<vmem>>, vector<1x128xf32>,
    %cst_59 = arith.constant 0.000000e+00 : f32
    %55 = vector.broadcast %cst_59 : f32 to vector<10x64xf32>
    %c0_60 = arith.constant 0 : index
    %c0_61 = arith.constant 0 : index
    %56 = vector.load %arg10[%c0_60, %c0_61] : memref<10x64xf32, #tpu.memory_space<vmem>>, vector<10x64xf32>
    tpu.vector_store %arg10[%c0_60, %c0_61], %55 {strides = array<i32>} : memref<10x64xf32, #tpu.memory_space<vmem>>, vector<10x64xf32>,
    %c0_62 = arith.constant 0 : index
    %c0_63 = arith.constant 0 : index
    %57 = vector.load %arg3[%c0_62, %c0_63] : memref<1x8xf32, #tpu.memory_space<vmem>>, vector<1x8xf32>
    %c0_64 = arith.constant 0 : index
    %c0_65 = arith.constant 0 : index
    %58 = vector.load %arg9[%c0_64, %c0_65] : memref<8x128xf32, #tpu.memory_space<vmem>>, vector<8x8xf32>
    %c0_66 = arith.constant 0 : index
    %c8_67 = arith.constant 8 : index
    %59 = vector.load %arg9[%c0_66, %c8_67] : memref<8x128xf32, #tpu.memory_space<vmem>>, vector<8x8xf32>
    %60 = arith.maximumf %58, %59 : vector<8x8xf32>
    %61 = vector.broadcast %57 : vector<1x8xf32> to vector<8x8xf32>
    %62 = arith.addf %60, %61 : vector<8x8xf32>
    %cst_68 = arith.constant 0.000000e+00 : f32
    %63 = vector.broadcast %cst_68 : f32 to vector<8x8xf32>
    %64 = arith.maximumf %62, %63 : vector<8x8xf32>
    %c1_69 = arith.constant 1 : index
    %c0_70 = arith.constant 0 : index
    %65 = vector.load %arg10[%c1_69, %c0_70] : memref<10x64xf32, #tpu.memory_space<vmem>>, vector<8x8xf32>
    tpu.vector_store %arg10[%c1_69, %c0_70], %64 {strides = array<i32>} : memref<10x64xf32, #tpu.memory_space<vmem>>, vector<8x8xf32>,
    %c0_71 = arith.constant 0 : index
    %c16 = arith.constant 16 : index
    %66 = vector.load %arg9[%c0_71, %c16] : memref<8x128xf32, #tpu.memory_space<vmem>>, vector<8x8xf32>
    %c0_72 = arith.constant 0 : index
    %c24 = arith.constant 24 : index
    %67 = vector.load %arg9[%c0_72, %c24] : memref<8x128xf32, #tpu.memory_space<vmem>>, vector<8x8xf32>
    %68 = arith.maximumf %66, %67 : vector<8x8xf32>
    %69 = vector.broadcast %57 : vector<1x8xf32> to vector<8x8xf32>
    %70 = arith.addf %68, %69 : vector<8x8xf32>
    %cst_73 = arith.constant 0.000000e+00 : f32
    %71 = vector.broadcast %cst_73 : f32 to vector<8x8xf32>
    %72 = arith.maximumf %70, %71 : vector<8x8xf32>
    %c1_74 = arith.constant 1 : index
    %c8_75 = arith.constant 8 : index
    %73 = vector.load %arg10[%c1_74, %c8_75] : memref<10x64xf32, #tpu.memory_space<vmem>>, vector<8x8xf32>
    tpu.vector_store %arg10[%c1_74, %c8_75], %72 {strides = array<i32>} : memref<10x64xf32, #tpu.memory_space<vmem>>, vector<8x8xf32>,
    %c0_76 = arith.constant 0 : index
    %c32 = arith.constant 32 : index
    %74 = vector.load %arg9[%c0_76, %c32] : memref<8x128xf32, #tpu.memory_space<vmem>>, vector<8x8xf32>
    %c0_77 = arith.constant 0 : index
    %c40 = arith.constant 40 : index
    %75 = vector.load %arg9[%c0_77, %c40] : memref<8x128xf32, #tpu.memory_space<vmem>>, vector<8x8xf32>
    %76 = arith.maximumf %74, %75 : vector<8x8xf32>
    %77 = vector.broadcast %57 : vector<1x8xf32> to vector<8x8xf32>
    %78 = arith.addf %76, %77 : vector<8x8xf32>
    %cst_78 = arith.constant 0.000000e+00 : f32
    %79 = vector.broadcast %cst_78 : f32 to vector<8x8xf32>
    %80 = arith.maximumf %78, %79 : vector<8x8xf32>
    %c1_79 = arith.constant 1 : index
    %c16_80 = arith.constant 16 : index
    %81 = vector.load %arg10[%c1_79, %c16_80] : memref<10x64xf32, #tpu.memory_space<vmem>>, vector<8x8xf32>
    tpu.vector_store %arg10[%c1_79, %c16_80], %80 {strides = array<i32>} : memref<10x64xf32, #tpu.memory_space<vmem>>, vector<8x8xf32>,
    %c0_81 = arith.constant 0 : index
    %c48 = arith.constant 48 : index
    %82 = vector.load %arg9[%c0_81, %c48] : memref<8x128xf32, #tpu.memory_space<vmem>>, vector<8x8xf32>
    %c0_82 = arith.constant 0 : index
    %c56 = arith.constant 56 : index
    %83 = vector.load %arg9[%c0_82, %c56] : memref<8x128xf32, #tpu.memory_space<vmem>>, vector<8x8xf32>
    %84 = arith.maximumf %82, %83 : vector<8x8xf32>
    %85 = vector.broadcast %57 : vector<1x8xf32> to vector<8x8xf32>
    %86 = arith.addf %84, %85 : vector<8x8xf32>
    %cst_83 = arith.constant 0.000000e+00 : f32
    %87 = vector.broadcast %cst_83 : f32 to vector<8x8xf32>
    %88 = arith.maximumf %86, %87 : vector<8x8xf32>
    %c1_84 = arith.constant 1 : index
    %c24_85 = arith.constant 24 : index
    %89 = vector.load %arg10[%c1_84, %c24_85] : memref<10x64xf32, #tpu.memory_space<vmem>>, vector<8x8xf32>
    tpu.vector_store %arg10[%c1_84, %c24_85], %88 {strides = array<i32>} : memref<10x64xf32, #tpu.memory_space<vmem>>, vector<8x8xf32>,
    %c0_86 = arith.constant 0 : index
    %c64 = arith.constant 64 : index
    %90 = vector.load %arg9[%c0_86, %c64] : memref<8x128xf32, #tpu.memory_space<vmem>>, vector<8x8xf32>
    %c0_87 = arith.constant 0 : index
    %c72 = arith.constant 72 : index
    %91 = vector.load %arg9[%c0_87, %c72] : memref<8x128xf32, #tpu.memory_space<vmem>>, vector<8x8xf32>
    %92 = arith.maximumf %90, %91 : vector<8x8xf32>
    %93 = vector.broadcast %57 : vector<1x8xf32> to vector<8x8xf32>
    %94 = arith.addf %92, %93 : vector<8x8xf32>
    %cst_88 = arith.constant 0.000000e+00 : f32
    %95 = vector.broadcast %cst_88 : f32 to vector<8x8xf32>
    %96 = arith.maximumf %94, %95 : vector<8x8xf32>
    %c1_89 = arith.constant 1 : index
    %c32_90 = arith.constant 32 : index
    %97 = vector.load %arg10[%c1_89, %c32_90] : memref<10x64xf32, #tpu.memory_space<vmem>>, vector<8x8xf32>
    tpu.vector_store %arg10[%c1_89, %c32_90], %96 {strides = array<i32>} : memref<10x64xf32, #tpu.memory_space<vmem>>, vector<8x8xf32>,
    %c0_91 = arith.constant 0 : index
    %c80 = arith.constant 80 : index
    %98 = vector.load %arg9[%c0_91, %c80] : memref<8x128xf32, #tpu.memory_space<vmem>>, vector<8x8xf32>
    %c0_92 = arith.constant 0 : index
    %c88 = arith.constant 88 : index
    %99 = vector.load %arg9[%c0_92, %c88] : memref<8x128xf32, #tpu.memory_space<vmem>>, vector<8x8xf32>
    %100 = arith.maximumf %98, %99 : vector<8x8xf32>
    %101 = vector.broadcast %57 : vector<1x8xf32> to vector<8x8xf32>
    %102 = arith.addf %100, %101 : vector<8x8xf32>
    %cst_93 = arith.constant 0.000000e+00 : f32
    %103 = vector.broadcast %cst_93 : f32 to vector<8x8xf32>
    %104 = arith.maximumf %102, %103 : vector<8x8xf32>
    %c1_94 = arith.constant 1 : index
    %c40_95 = arith.constant 40 : index
    %105 = vector.load %arg10[%c1_94, %c40_95] : memref<10x64xf32, #tpu.memory_space<vmem>>, vector<8x8xf32>
    tpu.vector_store %arg10[%c1_94, %c40_95], %104 {strides = array<i32>} : memref<10x64xf32, #tpu.memory_space<vmem>>, vector<8x8xf32>,
    %c0_96 = arith.constant 0 : index
    %c96 = arith.constant 96 : index
    %106 = vector.load %arg9[%c0_96, %c96] : memref<8x128xf32, #tpu.memory_space<vmem>>, vector<8x8xf32>
    %c0_97 = arith.constant 0 : index
    %c104 = arith.constant 104 : index
    %107 = vector.load %arg9[%c0_97, %c104] : memref<8x128xf32, #tpu.memory_space<vmem>>, vector<8x8xf32>
    %108 = arith.maximumf %106, %107 : vector<8x8xf32>
    %109 = vector.broadcast %57 : vector<1x8xf32> to vector<8x8xf32>
    %110 = arith.addf %108, %109 : vector<8x8xf32>
    %cst_98 = arith.constant 0.000000e+00 : f32
    %111 = vector.broadcast %cst_98 : f32 to vector<8x8xf32>
    %112 = arith.maximumf %110, %111 : vector<8x8xf32>
    %c1_99 = arith.constant 1 : index
    %c48_100 = arith.constant 48 : index
    %113 = vector.load %arg10[%c1_99, %c48_100] : memref<10x64xf32, #tpu.memory_space<vmem>>, vector<8x8xf32>
    tpu.vector_store %arg10[%c1_99, %c48_100], %112 {strides = array<i32>} : memref<10x64xf32, #tpu.memory_space<vmem>>, vector<8x8xf32>,
    %c0_101 = arith.constant 0 : index
    %c112 = arith.constant 112 : index
    %114 = vector.load %arg9[%c0_101, %c112] : memref<8x128xf32, #tpu.memory_space<vmem>>, vector<8x8xf32>
    %c0_102 = arith.constant 0 : index
    %c120 = arith.constant 120 : index
    %115 = vector.load %arg9[%c0_102, %c120] : memref<8x128xf32, #tpu.memory_space<vmem>>, vector<8x8xf32>
    %116 = arith.maximumf %114, %115 : vector<8x8xf32>
    %117 = vector.broadcast %57 : vector<1x8xf32> to vector<8x8xf32>
    %118 = arith.addf %116, %117 : vector<8x8xf32>
    %cst_103 = arith.constant 0.000000e+00 : f32
    %119 = vector.broadcast %cst_103 : f32 to vector<8x8xf32>
    %120 = arith.maximumf %118, %119 : vector<8x8xf32>
    %c1_104 = arith.constant 1 : index
    %c56_105 = arith.constant 56 : index
    %121 = vector.load %arg10[%c1_104, %c56_105] : memref<10x64xf32, #tpu.memory_space<vmem>>, vector<8x8xf32>
    tpu.vector_store %arg10[%c1_104, %c56_105], %120 {strides = array<i32>} : memref<10x64xf32, #tpu.memory_space<vmem>>, vector<8x8xf32>,
    %c0_106 = arith.constant 0 : index
    %c0_107 = arith.constant 0 : index
    %122 = vector.load %arg10[%c0_106, %c0_107] : memref<10x64xf32, #tpu.memory_space<vmem>>, vector<8x64xf32>
    %123 = arith.truncf %122 : vector<8x64xf32> to vector<8x64xbf16>
    %c0_108 = arith.constant 0 : index
    %c0_109 = arith.constant 0 : index
    %c0_110 = arith.constant 0 : index
    %124 = vector.load %arg4[%c0_108, %c0_109, %c0_110] : memref<3x64x128xbf16, #tpu.memory_space<vmem>>, vector<1x64x128xbf16>
    %125 = vector.shape_cast %124 : vector<1x64x128xbf16> to vector<64x128xbf16>
    %cst_111 = arith.constant dense<0.000000e+00> : vector<8x128xf32>
    %126 = tpu.matmul %123, %125, %cst_111 {dimension_numbers = #tpu.dot_dimension_numbers<[1], [0], [0], [1], [0, 0, 1, 1], [], []>} : vector<8x64xbf16>, vector<64x128xbf16>, vector<8x128xf32> -> vector<8x128xf32>
    %c1_112 = arith.constant 1 : index
    %c0_113 = arith.constant 0 : index
    %127 = vector.load %arg10[%c1_112, %c0_113] : memref<10x64xf32, #tpu.memory_space<vmem>>, vector<8x64xf32>
    %128 = arith.truncf %127 : vector<8x64xf32> to vector<8x64xbf16>
    %c1_114 = arith.constant 1 : index
    %c0_115 = arith.constant 0 : index
    %c0_116 = arith.constant 0 : index
    %129 = vector.load %arg4[%c1_114, %c0_115, %c0_116] : memref<3x64x128xbf16, #tpu.memory_space<vmem>>, vector<1x64x128xbf16>
    %130 = vector.shape_cast %129 : vector<1x64x128xbf16> to vector<64x128xbf16>
    %cst_117 = arith.constant dense<0.000000e+00> : vector<8x128xf32>
    %131 = tpu.matmul %128, %130, %cst_117 {dimension_numbers = #tpu.dot_dimension_numbers<[1], [0], [0], [1], [0, 0, 1, 1], [], []>} : vector<8x64xbf16>, vector<64x128xbf16>, vector<8x128xf32> -> vector<8x128xf32>
    %132 = arith.addf %126, %131 : vector<8x128xf32>
    %c2_118 = arith.constant 2 : index
    %c0_119 = arith.constant 0 : index
    %133 = vector.load %arg10[%c2_118, %c0_119] : memref<10x64xf32, #tpu.memory_space<vmem>>, vector<8x64xf32>
    %134 = arith.truncf %133 : vector<8x64xf32> to vector<8x64xbf16>
    %c2_120 = arith.constant 2 : index
    %c0_121 = arith.constant 0 : index
    %c0_122 = arith.constant 0 : index
    %135 = vector.load %arg4[%c2_120, %c0_121, %c0_122] : memref<3x64x128xbf16, #tpu.memory_space<vmem>>, vector<1x64x128xbf16>
    %136 = vector.shape_cast %135 : vector<1x64x128xbf16> to vector<64x128xbf16>
    %cst_123 = arith.constant dense<0.000000e+00> : vector<8x128xf32>
    %137 = tpu.matmul %134, %136, %cst_123 {dimension_numbers = #tpu.dot_dimension_numbers<[1], [0], [0], [1], [0, 0, 1, 1], [], []>} : vector<8x64xbf16>, vector<64x128xbf16>, vector<8x128xf32> -> vector<8x128xf32>
    %138 = arith.addf %132, %137 : vector<8x128xf32>
    %c0_124 = arith.constant 0 : index
    %c0_125 = arith.constant 0 : index
    %139 = vector.load %arg5[%c0_124, %c0_125] : memref<1x128xf32, #tpu.memory_space<vmem>>, vector<1x128xf32>
    %140 = vector.broadcast %139 : vector<1x128xf32> to vector<8x128xf32>
    %141 = arith.addf %138, %140 : vector<8x128xf32>
    %cst_126 = arith.constant 0.000000e+00 : f32
    %142 = vector.broadcast %cst_126 : f32 to vector<8x128xf32>
    %143 = arith.maximumf %141, %142 : vector<8x128xf32>
    %c0_127 = arith.constant 0 : index
    %c0_128 = arith.constant 0 : index
    %c0_129 = arith.constant 0 : index
    %144 = vector.load %arg6[%c0_127, %c0_128, %c0_129] : memref<1x8x128xf32, #tpu.memory_space<vmem>>, vector<1x8x128xf32>
    %145 = vector.shape_cast %144 : vector<1x8x128xf32> to vector<8x128xf32>
    %146 = vector.shape_cast %143 : vector<8x128xf32> to vector<1x8x128xf32>
    tpu.vector_store %arg6[%c0_127, %c0_128, %c0_129], %146 {strides = array<i32>} : memref<1x8x128xf32, #tpu.memory_space<vmem>>, vector<1x8x128xf32>,
    return
  }
  func.func @transform_0(%arg0: i32) -> (i32, i32, i32) {
    %c0_i32 = arith.constant 0 : i32
    %c0_i32_0 = arith.constant 0 : i32
    %c0_i32_1 = arith.constant 0 : i32
    return %arg0, %c0_i32, %c0_i32_0 : i32, i32, i32
  }
  func.func @transform_1(%arg0: i32) -> (i32, i32, i32) {
    %c0_i32 = arith.constant 0 : i32
    %c0_i32_0 = arith.constant 0 : i32
    %c0_i32_1 = arith.constant 0 : i32
    %c0_i32_2 = arith.constant 0 : i32
    return %c0_i32, %c0_i32_0, %c0_i32_1 : i32, i32, i32
  }
  func.func @transform_2(%arg0: i32) -> (i32, i32) {
    %c0_i32 = arith.constant 0 : i32
    %c0_i32_0 = arith.constant 0 : i32
    %c0_i32_1 = arith.constant 0 : i32
    return %c0_i32, %c0_i32_0 : i32, i32
  }
  func.func @transform_3(%arg0: i32) -> (i32, i32, i32) {
    %c0_i32 = arith.constant 0 : i32
    %c0_i32_0 = arith.constant 0 : i32
    %c0_i32_1 = arith.constant 0 : i32
    %c0_i32_2 = arith.constant 0 : i32
    return %c0_i32, %c0_i32_0, %c0_i32_1 : i32, i32, i32
  }
  func.func @transform_4(%arg0: i32) -> (i32, i32) {
    %c0_i32 = arith.constant 0 : i32
    %c0_i32_0 = arith.constant 0 : i32
    %c0_i32_1 = arith.constant 0 : i32
    return %c0_i32, %c0_i32_0 : i32, i32
  }
  func.func @transform_5(%arg0: i32) -> (i32, i32, i32) {
    %c0_i32 = arith.constant 0 : i32
    %c0_i32_0 = arith.constant 0 : i32
    %c0_i32_1 = arith.constant 0 : i32
    return %arg0, %c0_i32, %c0_i32_0 : i32, i32, i32
  }
}

</mosaic_0001>

<bundles_post_ra>
// kernel: _forward_impl.1
= control target key start
LH: loop header
LB: loop body
LE: loop exit
PB: predicated region body
PF: predicated region fallthrough
CT: control target
= control target key end

     0   :  { %s1216_s18 = smov 0   ;;  %s1410_s0 = inlined_call_operand.vmem [shape: f32[2,16,64], index: 0, kind: input, shape index: {}]   ;;  %s1411_s1 = inlined_call_operand.vmem [shape: bf16[3,64,128], index: 1, kind: input, shape index: {}]   ;;  %s1412_s2 = inlined_call_operand.vmem [shape: f32[1,8], index: 2, kind: input, shape index: {}]   ;;  %s1413_s3 = inlined_call_operand.vmem [shape: bf16[3,64,128], index: 3, kind: input, shape index: {}]   ;;  %s1414_s4 = inlined_call_operand.vmem [shape: f32[1,128], index: 4, kind: input, shape index: {}]   ;;  %s1415_s5 = inlined_call_operand.vmem [shape: f32[2,8,128], index: 5, kind: output, shape index: {}]  }
   0x1 LB: > { %s943_s19 = sadd.s32 4294967295, %s1171_s18   ;;  %p947_p0 = scmp.ge.s32.totalorder %s1171_s18, 1  ;;  %s1171_s18 = sphi %s1216_s18, %s15_s18  }
   0x2   : > { %p187_p1 = scmp.lt.s32.totalorder %s1171_s18, 3 }
   0x4   : > { %p188_p2 = pnand %p947_p0, %p187_p1 }
   0x5   : > { %p214_p3 = scmp.lt.s32.totalorder (!%p188_p2), %s943_s19, 1  ;;  %s1175_s27 = smov (!%p188_p2), 32  }
   0x6   : > { %191 = sbr.rel (%p188_p2) target bundleno = 744 (0x2e8), region = 40  ;;  %s1176_s28 = smov (!%p188_p2), 48  }
   0x7   : > { %s1177_s29 = smov (!%p188_p2), 16   ;;  %s1179_s6 = smov (!%p188_p2), 120  }
   0x8   : > { %s1180_s7 = smov (!%p188_p2), 80   ;;  %s1181_s8 = smov (!%p188_p2), 96  }
   0x9   : > { %s1182_s9 = smov (!%p188_p2), 112   ;;  %s1183_s20 = smov (!%p188_p2), 104  }
   0xb   : > { %v1141_v0 = vld [vmem:[%s1411_s1 + $0x38] sm:$0xff]   ;;  %v1173_v1 = vmov 0.0   ;;  %v1143_v3 = vld [vmem:[%s1411_s1 + $0x30] sm:$0xff]   ;;  %vm1174_vm0 = vmmov 0   ;;  %vm224_vm1 = vcmask 523264   ;;  %s1417_s19 = smov (!%p214_p3, %s943_s19), 1 }
   0xc   : > { %1048 = vmatprep.subr.bf16.mxu0 %v1173_v1  ;;  %1060 = vmatprep.subr.bf16.mxu1 %v1173_v1  ;;  %v1142_v2 = vld [vmem:[%s1411_s1 + $0x18] sm:$0xff]   ;;  %v1144_v4 = vld [vmem:[%s1411_s1 + $0x10] sm:$0xff]   ;;  %225 = vst.msk [vmem:[#allocation2] sm:$0xff] %vm224_vm1, %v1173_v1  ;;  %226 = vst.msk [vmem:[#allocation2 + $0x8] sm:$0xff] %vm224_vm1, %v1173_v1  ;;  %vm227_vm2 = vcmask 517120   ;;  %s1017_s30 = sshll.u32 %s1417_s19, 4 }
   0xd   : > { %1049 = vmatpush3.bf16.msra.mxu0 %v1141_v0  ;;  %1056 = vmatprep.mubr.msk.bf16.mxu0 %vm1174_vm0, %v1173_v1  ;;  %508 = vst.msk [vmem:[#allocation5] sm:$0xff] %vm224_vm1, %v1173_v1  ;;  %v1145_v5 = vld [vmem:[%s1411_s1 + $0x28] sm:$0xff]   ;;  %s218_s10 = scalar_lea.vmem %s1410_s0, %s1017_s30  ;;  %v1147_v9 = vld [vmem:[%s1411_s1 + $0x20] sm:$0xff]   ;;  %v1149_v11 = vld [vmem:[%s1411_s1 + $0x58] sm:$0xff]   ;;  %s1178_s30 = smov 64   ;;  %vm525_vm3 = vcmask 64512  }
   0xe   : > { %1061 = vmatpush3.bf16.msra.mxu1 %v1142_v2  ;;  %1050 = vmatprep.subr.bf16.mxu0 %v1173_v1  ;;  %228 = vst.msk [vmem:[#allocation2 + $0x10] sm:$0x3] %vm227_vm2, %v1173_v1  ;;  %509 = vst.msk [vmem:[#allocation5 + $0x8] sm:$0x3] %vm227_vm2, %v1173_v1  ;;  %v1146_v6 = vld [vmem:[%s1411_s1 + $0x8] sm:$0xff]   ;;  %v229_v7 = vld [vmem:[%s218_s10] sm:$0xff] }
   0xf   : > { %1062 = vmatprep.subr.bf16.mxu1 %v1173_v1  ;;  %1068 = vmatprep.mubr.msk.bf16.mxu1 %vm1174_vm0, %v1173_v1  ;;  %v230_v8 = vld [vmem:[%s218_s10 + $0x8] sm:$0xff]  ;;  %231 = vst.msk [vmem:[#allocation2 + $0x1] sm:$0xff] %vm224_vm1, %v229_v7  ;;  %v1148_v10 = vld [vmem:[%s1411_s1] sm:$0xff]   ;;  %v1150_v18 = vld [vmem:[%s1411_s1 + $0x50] sm:$0xff]   ;;  %vm542_vm4 = vcmask 130112   ;;  %vm559_vm5 = vcmask 195712  }
  0x10   : > { %232 = vst.msk [vmem:[#allocation2 + $0x9] sm:$0xff] %vm224_vm1, %v230_v8  ;;  %v1151_v19 = vld [vmem:[%s1411_s1 + $0x48] sm:$0xff]   ;;  %v1152_v20 = vld [vmem:[%s1411_s1 + $0x40] sm:$0xff]   ;;  %vm576_vm6 = vcmask 261312   ;;  %vm593_vm7 = vcmask 326912   ;;  %vm610_vm8 = vcmask 392512  }
  0x11   : > { %1051 = vmatpush3.bf16.msra.mxu0 %v1143_v3  ;;  %v1306_v24 = vld [vmem:[%s1412_s2] ss:$0 sm:$0xff]  ;;  %vm627_vm9 = vcmask 458112   ;;  %vm644_vm10 = vcmask 523712   ;;  %s950_s16 = sshll.u32 %s1417_s19, 3 }
  0x12   : > { %1063 = vmatpush3.bf16.msra.mxu1 %v1144_v4  ;;  %1052 = vmatprep.subr.bf16.mxu0 %v1173_v1  ;;  %s222_s21 = scalar_lea.vmem %s1415_s5, %s950_s16 }
  0x13   : > { %1064 = vmatprep.subr.bf16.mxu1 %v1173_v1  ;;  %550 = vrot.lane.b32.xlu0 %v1306_v24, %s1175_s27  ;;  %s1184_s27 = smov 88  }
  0x14   : > { %533 = vrot.lane.b32.xlu1 %v1306_v24, %s1177_s29 }
  0x15   : > { %1053 = vmatpush3.bf16.msra.mxu0 %v1145_v5 }
  0x16   : > { %1065 = vmatpush3.bf16.msra.mxu1 %v1146_v6  ;;  %1054 = vmatprep.subr.bf16.mxu0 %v1173_v1  ;;  %v244_v12 = vld [vmem:[#allocation2 + $0x1] sm:$0xff] }
  0x17   : > { %1066 = vmatprep.subr.bf16.mxu1 %v1173_v1  ;;  %v245_v13 = vld [vmem:[#allocation2 + $0x9] sm:$0xff]  ;;  %v233_v14 = vld [vmem:[#allocation2] sm:$0xff]  ;;  %567 = vrot.lane.b32.xlu0 %v1306_v24, %s1176_s28 }
  0x18   : > { %v246_v15 = vpack.c.bf16 %v245_v13, %v244_v12  ;;  %v234_v16 = vld [vmem:[#allocation2 + $0x8] sm:$0xff] }
  0x19   : > { %1055 = vmatpush3.bf16.msra.mxu0 %v1147_v9  ;;  %v235_v17 = vpack.c.bf16 %v234_v16, %v233_v14  ;;  %v392_v21 = vld [vmem:[#allocation2 + $0x2] sm:$0xff]  ;;  %v393_v22 = vld [vmem:[#allocation2 + $0xa] sm:$0xff]  ;;  %v1153_v14 = vld [vmem:[%s1413_s3 + $0x38] sm:$0xff]  }
  0x1a   : > { %1067 = vmatpush3.bf16.msra.mxu1 %v1148_v10  ;;  %1072 = vmatprep.subr.bf16.mxu0 %v1173_v1  ;;  %v394_v23 = vpack.c.bf16 %v393_v22, %v392_v21 }
  0x1b   : > { %1084 = vmatprep.subr.bf16.mxu1 %v1173_v1  ;;  %584 = vrot.lane.b32.xlu0 %v1306_v24, %s1178_s30  ;;  %s1185_s30 = smov 72  }
  0x1c   : > { %1057 = vmatmul.mubr.msk.bf16.vlgmr.msra.gmra.mxu0 %vm224_vm1, %v246_v15 }
  0x1d   : > { %1069 = vmatmul.mubr.msk.bf16.vlgmr.msra.gmra.mxu1 %vm224_vm1, %v235_v17  ;;  %1073 = vmatpush3.bf16.msra.mxu0 %v1149_v11 }
  0x1e   : > { %1074 = vmatprep.subr.bf16.mxu0 %v1173_v1  ;;  %1080 = vmatprep.mubr.msk.bf16.mxu0 %vm1174_vm0, %v1173_v1 }
  0x1f   : > { %1092 = vmatprep.mubr.msk.bf16.mxu1 %vm1174_vm0, %v1173_v1  ;;  %1085 = vmatpush3.bf16.msra.mxu1 %v1153_v14 }
  0x20   : > { %1086 = vmatprep.subr.bf16.mxu1 %v1173_v1 }
  0x21   : > { %1075 = vmatpush3.bf16.msra.mxu0 %v1150_v18 }
  0x22   : > { %1076 = vmatprep.subr.bf16.mxu0 %v1173_v1 }
  0x25   : > { %1077 = vmatpush3.bf16.msra.mxu0 %v1151_v19  ;;  %v1154_v19 = vld [vmem:[%s1413_s3 + $0x18] sm:$0xff]  }
  0x26   : > { %1078 = vmatprep.subr.bf16.mxu0 %v1173_v1 }
  0x29   : > { %1079 = vmatpush3.bf16.msra.mxu0 %v1152_v20  ;;  %v1155_v20 = vld [vmem:[%s1413_s3 + $0x30] sm:$0xff]  }
  0x2a   : > { %1096 = vmatprep.subr.bf16.mxu0 %v1173_v1  ;;  %1087 = vmatpush3.bf16.msra.mxu1 %v1155_v20 }
  0x2b   : > { %1088 = vmatprep.subr.bf16.mxu1 %v1173_v1 }
  0x2c   : > { %1081 = vmatmul.mubr.msk.bf16.vlgmr.msra.gmra.mxu0 %vm224_vm1, %v394_v23 }
  0x2d   : > { %1104 = vmatprep.mubr.msk.bf16.mxu0 %vm1174_vm0, %v1173_v1  ;;  %1097 = vmatpush3.bf16.msra.mxu0 %v1154_v19 }
  0x2e   : > { %1098 = vmatprep.subr.bf16.mxu0 %v1173_v1 }
  0x85   : > { %v551_v3 = vpop.permute.xlu0 %550 }
  0x86   : > { %v534_v6 = vpop.permute.xlu1 %533 }
  0x89   : > { %v568_v4 = vpop.permute.xlu0 %567 }
  0x8d   : > { %v585_v5 = vpop.permute.xlu0 %584 }
  0xdc   : > { %v317_v25 = vpop.f32.mrf.mxu0 }
  0xdd   : > { %v385_v26 = vpop.f32.mrf.mxu1 }
  0xde   : > { %v1058_v27 = vpop.f32.mrf.mxu0  ;;  %v386_v33 = vadd.f32 %v385_v26, %v317_v25  ;;  %v1156_v25 = vld [vmem:[%s1413_s3 + $0x10] sm:$0xff]  }
  0xdf   : > { %v1070_v28 = vpop.f32.mrf.mxu1  ;;  %1099 = vmatpush3.bf16.msra.mxu0 %v1156_v25 }
  0xe0   : > { %v320_v29 = vpop.f32.mrf.mxu0  ;;  %1100 = vmatprep.subr.bf16.mxu0 %v1173_v1 }
  0xe1   : > { %v388_v30 = vpop.f32.mrf.mxu1 }
  0xe2   : > { %v1059_v31 = vpop.f32.mrf.mxu0  ;;  %v389_v37 = vadd.f32 %v388_v30, %v320_v29 }
  0xe3   : > { %v1071_v32 = vpop.f32.mrf.mxu1 }
  0xec   : > { %v465_v34 = vpop.f32.mrf.mxu0 }
  0xed   : > { %v472_v35 = vadd.f32 %v465_v34, %v386_v33  ;;  %v1157_v33 = vld [vmem:[%s1413_s3 + $0x28] sm:$0xff]  }
  0xee   : > { %v1082_v36 = vpop.f32.mrf.mxu0  ;;  %v1158_v34 = vld [vmem:[%s1413_s3 + $0x8] sm:$0xff]   ;;  %1089 = vmatpush3.bf16.msra.mxu1 %v1157_v33 }
  0xef   : > { %474 = vst [vmem:[#allocation3] sm:$0xff] %v472_v35  ;;  %1101 = vmatpush3.bf16.msra.mxu0 %v1158_v34  ;;  %1090 = vmatprep.subr.bf16.mxu1 %v1173_v1 }
  0xf0   : > { %v468_v38 = vpop.f32.mrf.mxu0  ;;  %1102 = vmatprep.subr.bf16.mxu0 %v1173_v1 }
  0xf1   : > { %v473_v39 = vadd.f32 %v468_v38, %v389_v37  ;;  %v1159_v38 = vld [vmem:[%s1413_s3 + $0x20] sm:$0xff]  }
  0xf2   : > { %v1083_v40 = vpop.f32.mrf.mxu0  ;;  %1091 = vmatpush3.bf16.msra.mxu1 %v1159_v38 }
  0xf3   : > { %475 = vst [vmem:[#allocation3 + $0x8] sm:$0xff] %v473_v39  ;;  %1108 = vmatprep.subr.bf16.mxu1 %v1173_v1 }
  0xf6   : > { %v476_v41 = vld [vmem:[#allocation3] sm:$0x1]  ;;  %v477_v42 = vld [vmem:[#allocation3 + $0x1] sm:$0x1]  ;;  %v480_v43 = vld [vmem:[#allocation3 + $0x2] sm:$0x1] }
  0xf7   : > { %v478_v44 = vmax.f32 %v476_v41, %v477_v42  ;;  %v481_v45 = vld [vmem:[#allocation3 + $0x3] sm:$0x1]  ;;  %v484_v46 = vld [vmem:[#allocation3 + $0x4] sm:$0x1]  ;;  %v485_v47 = vld [vmem:[#allocation3 + $0x5] sm:$0x1] }
  0xf8   : > { %v482_v48 = vmax.f32 %v480_v43, %v481_v45  ;;  %v486_v49 = vmax.f32 %v484_v46, %v485_v47  ;;  %v488_v50 = vld [vmem:[#allocation3 + $0x6] sm:$0x1]  ;;  %v489_v51 = vld [vmem:[#allocation3 + $0x7] sm:$0x1]  ;;  %v1160_v42 = vld [vmem:[%s1413_s3] sm:$0xff]  }
  0xf9   : > { %v490_v52 = vmax.f32 %v488_v50, %v489_v51  ;;  %479 = vst [vmem:[#allocation4] sm:$0x1] %v478_v44  ;;  %1103 = vmatpush3.bf16.msra.mxu0 %v1160_v42 }
  0xfa   : > { %483 = vst [vmem:[#allocation4 + $0x1] sm:$0x1] %v482_v48  ;;  %487 = vst [vmem:[#allocation4 + $0x2] sm:$0x1] %v486_v49  ;;  %v492_v53 = vld [vmem:[#allocation3 + $0x8] sm:$0x1] }
  0xfb   : > { %v493_v54 = vld [vmem:[#allocation3 + $0x9] sm:$0x1]  ;;  %v496_v55 = vld [vmem:[#allocation3 + $0xa] sm:$0x1]  ;;  %491 = vst [vmem:[#allocation4 + $0x3] sm:$0x1] %v490_v52 }
  0xfc   : > { %v494_v56 = vmax.f32 %v492_v53, %v493_v54  ;;  %v497_v57 = vld [vmem:[#allocation3 + $0xb] sm:$0x1]  ;;  %v500_v58 = vld [vmem:[#allocation3 + $0xc] sm:$0x1]  ;;  %v501_v59 = vld [vmem:[#allocation3 + $0xd] sm:$0x1] }
  0xfd   : > { %v498_v60 = vmax.f32 %v496_v55, %v497_v57  ;;  %v502_v61 = vmax.f32 %v500_v58, %v501_v59  ;;  %v504_v62 = vld [vmem:[#allocation3 + $0xe] sm:$0x1]  ;;  %v505_v63 = vld [vmem:[#allocation3 + $0xf] sm:$0x1]  ;;  %v1161_v59 = vld [vmem:[%s1413_s3 + $0x58] sm:$0xff]  }
  0xfe   : > { %v506_v0 = vmax.f32 %v504_v62, %v505_v63  ;;  %495 = vst [vmem:[#allocation4 + $0x4] sm:$0x1] %v494_v56  ;;  %v1162_v62 = vld [vmem:[%s1413_s3 + $0x50] sm:$0xff]   ;;  %v1163_v63 = vld [vmem:[%s1413_s3 + $0x48] sm:$0xff]  }
  0xff   : > { %499 = vst [vmem:[#allocation4 + $0x5] sm:$0x1] %v498_v60  ;;  %503 = vst [vmem:[#allocation4 + $0x6] sm:$0x1] %v502_v61 }
 0x100   : > { %507 = vst [vmem:[#allocation4 + $0x7] sm:$0x1] %v506_v0  ;;  %v1164_v0 = vld [vmem:[%s1413_s3 + $0x40] sm:$0xff]  }
 0x107   : > { %v1312_v2 = vld [vmem:[#allocation4] sm:$0xff] }
 0x108   : > { %563 = vrot.lane.b32.xlu1 %v1312_v2, %s1179_s6  ;;  %529 = vrot.lane.b32.xlu0 %v1312_v2, %s1179_s6 }
 0x10c   : > { %580 = vrot.lane.b32.xlu1 %v1312_v2, %s1179_s6  ;;  %546 = vrot.lane.b32.xlu0 %v1312_v2, %s1179_s6 }
 0x110   : > { %597 = vrot.lane.b32.xlu1 %v1312_v2, %s1179_s6  ;;  %601 = vrot.lane.b32.xlu0 %v1306_v24, %s1180_s7 }
 0x114   : > { %614 = vrot.lane.b32.xlu1 %v1312_v2, %s1179_s6  ;;  %618 = vrot.lane.b32.xlu0 %v1306_v24, %s1181_s8 }
 0x118   : > { %631 = vrot.lane.b32.xlu1 %v1312_v2, %s1179_s6  ;;  %513 = vrot.lane.b32.xlu0 %v1312_v2, %s1179_s6 }
 0x11c   : > { %635 = vrot.lane.b32.xlu1 %v1306_v24, %s1182_s9 }
 0x17a   : > { %v564_v7 = vpop.permute.xlu1 %563  ;;  %v530_v8 = vpop.permute.xlu0 %529 }
 0x17b   : > { %v566_v9 = vmax.f32 %v1312_v2, %v564_v7  ;;  %v532_v10 = vmax.f32 %v1312_v2, %v530_v8 }
 0x17d   : > { %v536_v11 = vadd.f32 %v534_v6, %v532_v10  ;;  %v570_v15 = vadd.f32 %v568_v4, %v566_v9 }
 0x17e   : > { %v581_v12 = vpop.permute.xlu1 %580  ;;  %v547_v13 = vpop.permute.xlu0 %546 }
 0x17f   : > { %v537_v16 = vmax.f32 %v536_v11, 0.0  ;;  %v583_v17 = vmax.f32 %v1312_v2, %v581_v12  ;;  %v549_v18 = vmax.f32 %v1312_v2, %v547_v13  ;;  %v571_v26 = vmax.f32 %v570_v15, 0.0 }
 0x181   : > { %v553_v21 = vadd.f32 %v551_v3, %v549_v18  ;;  %539 = vrot.lane.b32.xlu1 %v537_v16, %s1179_s6  ;;  %v587_v27 = vadd.f32 %v585_v5, %v583_v17 }
 0x182   : > { %v598_v22 = vpop.permute.xlu1 %597  ;;  %v602_v23 = vpop.permute.xlu0 %601 }
 0x183   : > { %v554_v28 = vmax.f32 %v553_v21, 0.0  ;;  %v600_v29 = vmax.f32 %v1312_v2, %v598_v22  ;;  %v588_v35 = vmax.f32 %v587_v27, 0.0 }
 0x185   : > { %v604_v30 = vadd.f32 %v602_v23, %v600_v29  ;;  %573 = vrot.lane.b32.xlu1 %v571_v26, %s1183_s20  ;;  %556 = vrot.lane.b32.xlu0 %v554_v28, %s1182_s9 }
 0x186   : > { %v615_v31 = vpop.permute.xlu1 %614  ;;  %v619_v32 = vpop.permute.xlu0 %618 }
 0x187   : > { %v605_v36 = vmax.f32 %v604_v30, 0.0  ;;  %v617_v37 = vmax.f32 %v1312_v2, %v615_v31 }
 0x189   : > { %v621_v39 = vadd.f32 %v619_v32, %v617_v37  ;;  %607 = vrot.lane.b32.xlu1 %v605_v36, %s1184_s27  ;;  %590 = vrot.lane.b32.xlu0 %v588_v35, %s1181_s8 }
 0x18a   : > { %v632_v40 = vpop.permute.xlu1 %631  ;;  %v514_v41 = vpop.permute.xlu0 %513 }
 0x18b   : > { %v622_v43 = vmax.f32 %v621_v39, 0.0  ;;  %v516_v44 = vmax.f32 %v1312_v2, %v514_v41  ;;  %v634_v45 = vmax.f32 %v1312_v2, %v632_v40 }
 0x18d   : > { %v523_v46 = vadd.f32 %v1306_v24, %v516_v44  ;;  %624 = vrot.lane.b32.xlu0 %v622_v43, %s1180_s7 }
 0x18e   : > { %v636_v47 = vpop.permute.xlu1 %635 }
 0x18f   : > { %v524_v48 = vmax.f32 %v523_v46, 0.0  ;;  %v638_v49 = vadd.f32 %v636_v47, %v634_v45 }
 0x191   : > { %v639_v50 = vmax.f32 %v638_v49, 0.0  ;;  %526 = vst.msk [vmem:[#allocation5 + $0x1] sm:$0xff] %vm525_vm3, %v524_v48 }
 0x193   : > { %641 = vrot.lane.b32.xlu1 %v639_v50, %s1185_s30 }
 0x1f3   : > { %v540_v51 = vpop.permute.xlu1 %539 }
 0x1f4   : > { %543 = vst.msk [vmem:[#allocation5 + $0x1] sm:$0xff] %vm542_vm4, %v540_v51 }
 0x1f7   : > { %v574_v52 = vpop.permute.xlu1 %573  ;;  %v557_v24 = vpop.permute.xlu0 %556 }
 0x1f8   : > { %560 = vst.msk [vmem:[#allocation5 + $0x1] sm:$0xff] %vm559_vm5, %v557_v24 }
 0x1f9   : > { %577 = vst.msk [vmem:[#allocation5 + $0x1] sm:$0xff] %vm576_vm6, %v574_v52 }
 0x1fb   : > { %v608_v53 = vpop.permute.xlu1 %607  ;;  %v591_v54 = vpop.permute.xlu0 %590 }
 0x1fc   : > { %594 = vst.msk [vmem:[#allocation5 + $0x1] sm:$0xff] %vm593_vm7, %v591_v54 }
 0x1fd   : > { %611 = vst.msk [vmem:[#allocation5 + $0x1] sm:$0xff] %vm610_vm8, %v608_v53 }
 0x1ff   : > { %v625_v55 = vpop.permute.xlu0 %624 }
 0x200   : > { %628 = vst.msk [vmem:[#allocation5 + $0x1] sm:$0xff] %vm627_vm9, %v625_v55 }
 0x205   : > { %v642_v56 = vpop.permute.xlu1 %641 }
 0x206   : > { %645 = vst.msk [vmem:[#allocation5 + $0x1] sm:$0xff] %vm644_vm10, %v642_v56 }
 0x20d   : > { %v656_v57 = vld [vmem:[#allocation5 + $0x1] sm:$0xff] }
 0x20e   : > { %v646_v58 = vld [vmem:[#allocation5] sm:$0xff]  ;;  %v657_v60 = vpack.c.bf16 %v656_v57, %v656_v57 }
 0x20f   : > { %v647_v61 = vpack.c.bf16 %v646_v58, %v646_v58  ;;  %v801_v2 = vld [vmem:[#allocation5 + $0x2] sm:$0xff] }
 0x210   : > { %1093 = vmatmul.mubr.msk.bf16.vlgmr.msra.gmra.mxu1 %vm224_vm1, %v657_v60  ;;  %v802_v3 = vpack.c.bf16 %v801_v2, %v801_v2 }
 0x211   : > { %1105 = vmatmul.mubr.msk.bf16.vlgmr.msra.gmra.mxu0 %vm224_vm1, %v647_v61  ;;  %1109 = vmatpush3.bf16.msra.mxu1 %v1161_v59 }
 0x212   : > { %1116 = vmatprep.mubr.msk.bf16.mxu1 %vm1174_vm0, %v1173_v1  ;;  %1110 = vmatprep.subr.bf16.mxu1 %v1173_v1 }
 0x215   : > { %1111 = vmatpush3.bf16.msra.mxu1 %v1162_v62 }
 0x216   : > { %1112 = vmatprep.subr.bf16.mxu1 %v1173_v1 }
 0x219   : > { %1113 = vmatpush3.bf16.msra.mxu1 %v1163_v63 }
 0x21a   : > { %1114 = vmatprep.subr.bf16.mxu1 %v1173_v1  ;;  %v1014_v1 = vld [vmem:[%s1414_s4] ss:$0 sm:$0xff] }
 0x21d   : > { %1115 = vmatpush3.bf16.msra.mxu1 %v1164_v0 }
 0x220   : > { %1117 = vmatmul.mubr.msk.bf16.vlgmr.msra.gmra.mxu1 %vm224_vm1, %v802_v3 }
 0x2d0   : > { %v728_v4 = vpop.f32.mrf.mxu1 }
 0x2d1   : > { %v795_v5 = vpop.f32.mrf.mxu0 }
 0x2d2   : > { %v1094_v6 = vpop.f32.mrf.mxu1  ;;  %v796_v12 = vadd.f32 %v795_v5, %v728_v4 }
 0x2d3   : > { %v1106_v7 = vpop.f32.mrf.mxu0 }
 0x2d4   : > { %v731_v8 = vpop.f32.mrf.mxu1 }
 0x2d5   : > { %v798_v9 = vpop.f32.mrf.mxu0 }
 0x2d6   : > { %v1095_v10 = vpop.f32.mrf.mxu1 }
 0x2d7   : > { %v1107_v11 = vpop.f32.mrf.mxu0 }
 0x2e0   : > { %v873_v13 = vpop.f32.mrf.mxu1 }
 0x2e1   : > { %v879_v14 = vadd.f32 %v873_v13, %v796_v12 }
 0x2e2   : > { %v1118_v15 = vpop.f32.mrf.mxu1 }
 0x2e3   : > { %v887_v16 = vadd.f32 %v1014_v1, %v879_v14 }
 0x2e4   : > { %v876_v17 = vpop.f32.mrf.mxu1 }
 0x2e5   : > { %v888_v18 = vmax.f32 %v887_v16, 0.0 }
 0x2e6   : > { %v1119_v19 = vpop.f32.mrf.mxu1 }
 0x2e7   : > { %889 = vst [vmem:[%s222_s21] sm:$0xff] %v888_v18 }
 0x2e8 PF: > { %s15_s18 = sadd.s32 1, %s1171_s18  }
 0x2e9   : > { %p12_p4 = scmp.ge.s32.totalorder %s15_s18, 4  }
 0x2eb   :  { %14 = sbr.rel (!%p12_p4) target bundleno = 1 (0x1), region = 74 }

</bundles_post_ra>
